<compile_context>
chip_gen: v6e
topology: v6e:2x2x1
jax: 0.10.0
libtpu: 0.0.40
codegen_flags: <defaults>
</compile_context>

<pallas_src>
import jax
import jax.numpy as jnp
from jax.experimental import pallas as pl
from jax.experimental.pallas import tpu as pltpu


def _round_up(x, m):
    return ((x + m - 1) // m) * m


def _readout_kernel(x_ref, w1_ref, b1_ref, w2_ref, b2_ref, out_ref):
    # x_ref:  [TILE_B, K_pad]   flattened node hiddens (node-mean fused into w1_eff)
    # w1_ref: [K_pad, RH_pad]   tiled & 1/N-scaled first-layer weight (VMEM-resident)
    # b1_ref: [1, RH_pad]   w2_ref: [RH_pad, D_pad]   b2_ref: [1, D_pad]
    z = jnp.dot(x_ref[...], w1_ref[...], preferred_element_type=jnp.float32)
    z = z + b1_ref[...]
    z = jnp.where(z > 0, z, 0.01 * z)  # LeakyReLU, PyTorch default slope 0.01
    y = jnp.dot(z, w2_ref[...], preferred_element_type=jnp.float32) + b2_ref[...]
    out_ref[...] = y.astype(out_ref.dtype)


def _vmem_limits():
    """Per-generation VMEM sizing: scoped limit + budget for the streamed x input."""
    try:
        cap = int(pltpu.get_tpu_info().vmem_capacity_bytes)  # 128 MiB v5e/v6e, 64 MiB v7x
    except Exception:
        cap = 64 * 1024 * 1024                               # conservative (v7x per-TC)
    vmem_limit = min((cap * 3) // 4, 100 * 1024 * 1024)      # ~96 MiB v5e/v6e, 48 MiB v7x
    x_budget = (vmem_limit * 3) // 5                         # ~60% for double-buffered x
    return vmem_limit, x_budget


def prepare_readout_params(w1, b1, w2, b2, n_nodes, *, h_dtype=jnp.float32):
    """One-time parameter transform (call once at init, NOT per forward)."""
    H, RH = w1.shape
    D = w2.shape[1]
    k_pad = _round_up(n_nodes * H, 128)
    rh_pad = _round_up(RH, 128)
    d_pad = _round_up(D, 128)

    # Fuse the node mean into the first matmul:
    #   mean_n(h_n) @ w1  ==  concat_n(h_n) @ (tile(w1, (N, 1)) / N)
    w1_eff = jnp.tile(w1.astype(jnp.float32), (n_nodes, 1)) * (1.0 / n_nodes)
    w1_eff = jnp.pad(w1_eff, ((0, k_pad - n_nodes * H), (0, rh_pad - RH)))
    if jnp.dtype(h_dtype) == jnp.bfloat16:
        w1_eff = w1_eff.astype(jnp.bfloat16)  # native bf16 MXU path on v6e/v7x

    b1p = jnp.pad(b1.astype(jnp.float32).reshape(1, RH), ((0, 0), (0, rh_pad - RH)))
    w2p = jnp.pad(w2.astype(jnp.float32), ((0, rh_pad - RH), (0, d_pad - D)))
    b2p = jnp.pad(b2.astype(jnp.float32).reshape(1, D), ((0, 0), (0, d_pad - D)))

    return dict(w1_eff=w1_eff, b1=b1p, w2=w2p, b2=b2p,
                n_nodes=n_nodes, hidden_dim=H, readout_dim=D)


def fully_connected_readout(h, params):
    """h: [N_nodes, B, H] node hidden states (f32 or bf16). Returns [B, D] f32."""
    N, B, H = h.shape
    assert N == params["n_nodes"] and H == params["hidden_dim"]
    D = params["readout_dim"]
    w1_eff, b1, w2, b2 = params["w1_eff"], params["b1"], params["w2"], params["b2"]
    k_pad, rh_pad = w1_eff.shape
    d_pad = w2.shape[1]

    # Lane-dense input slab: [B, N*H] (last dim padded to a multiple of 128).
    # TODO(synk): have the GNN emit node hiddens as [B, N*H] directly to drop this transpose.
    x = jnp.transpose(h, (1, 0, 2)).reshape(B, N * H)
    x_itemsize = jnp.dtype(x.dtype).itemsize

    vmem_limit, x_budget = _vmem_limits()
    row_mult = {1: 32, 2: 16, 4: 8}.get(x_itemsize, 8)  # sublane packing per dtype

    # Largest batch tile whose double-buffered x block fits the per-generation budget.
    fit = x_budget // (2 * k_pad * x_itemsize)
    fit = max(row_mult, (fit // row_mult) * row_mult)
    if fit >= 512:
        fit = (fit // 256) * 256  # MXU-friendly granularity for big tiles
    fit = min(fit, 4096)

    b_min = _round_up(B, row_mult)
    if b_min <= fit:
        # Whole (padded) batch fits one tile: still split into >= 2 grid steps when
        # possible so both v7x TensorCores get work on the "parallel" axis.
        if b_min >= 2 * row_mult:
            tile_b = _round_up(pl.cdiv(b_min, 2), row_mult)
        else:
            tile_b = b_min
    else:
        tile_b = fit
    b_pad = _round_up(B, tile_b)
    # TODO(synk): for very large N*H (tile_b collapsing toward row_mult), add an inner
    # "arbitrary" grid axis over node chunks with an f32 scratch accumulator instead.

    if (b_pad != B) or (k_pad != N * H):
        x = jnp.pad(x, ((0, b_pad - B), (0, k_pad - N * H)))

    cost = pl.CostEstimate(
        flops=2 * b_pad * (k_pad * rh_pad + rh_pad * d_pad),
        transcendentals=0,
        bytes_accessed=(b_pad * k_pad * x_itemsize
                        + k_pad * rh_pad * w1_eff.dtype.itemsize
                        + (rh_pad + rh_pad * d_pad + d_pad) * 4
                        + b_pad * d_pad * 4),
    )

    out = pl.pallas_call(
        _readout_kernel,
        out_shape=jax.ShapeDtypeStruct((b_pad, d_pad), jnp.float32),
        grid=(b_pad // tile_b,),
        in_specs=[
            pl.BlockSpec((tile_b, k_pad), lambda i: (i, 0)),   # streamed over batch
            pl.BlockSpec((k_pad, rh_pad), lambda i: (0, 0)),   # VMEM-resident weights
            pl.BlockSpec((1, rh_pad), lambda i: (0, 0)),
            pl.BlockSpec((rh_pad, d_pad), lambda i: (0, 0)),
            pl.BlockSpec((1, d_pad), lambda i: (0, 0)),
        ],
        out_specs=pl.BlockSpec((tile_b, d_pad), lambda i: (i, 0)),
        compiler_params=pltpu.CompilerParams(
            dimension_semantics=("parallel",),
            vmem_limit_bytes=int(vmem_limit),
        ),
        cost_estimate=cost,
    )(x, w1_eff, b1, w2, b2)

    return out[:B, :D]


def readout_forward(h, params, graph_targets, classify=False):
    """Full module forward: kernel for the hot path, dict glue in plain JAX."""
    x = fully_connected_readout(h, params)
    if classify:
        # clf mode: the single target gets the full logits
        return {graph_targets[0][0]: x}
    # reg mode: target i gets column i (matches x[:, i] in the PyTorch code)
    return {name: x[:, i] for i, (name, _dim) in enumerate(graph_targets)}


if __name__ == "__main__":
    # Config (regression mode): hidden_dim=32, readout_hidden_dim=64,
    # graph_targets = 4 targets of dim 1 -> readout_dim = 4, 8 nodes, batch 8.
    B, H, N_NODES, RH = 8, 32, 8, 64
    graph_targets = [("t0", 1), ("t1", 1), ("t2", 1), ("t3", 1)]
    D = sum(d for _, d in graph_targets)

    key = jax.random.PRNGKey(0)
    k_h, k_w1, k_b1, k_w2, k_b2 = jax.random.split(key, 5)

    # Node hidden states: [N_nodes, B, H] (graph traversal / stacking done host-side)
    h = jax.random.normal(k_h, (N_NODES, B, H), dtype=jnp.float32)

    # Deterministic parameter init (uniform, nn.Linear-like scale)
    w1 = jax.random.uniform(k_w1, (H, RH), jnp.float32, -1.0, 1.0) / jnp.sqrt(H)
    b1 = jax.random.uniform(k_b1, (1, RH), jnp.float32, -1.0, 1.0) / jnp.sqrt(H)
    w2 = jax.random.uniform(k_w2, (RH, D), jnp.float32, -1.0, 1.0) / jnp.sqrt(RH)
    b2 = jax.random.uniform(k_b2, (1, D), jnp.float32, -1.0, 1.0) / jnp.sqrt(RH)

    params = prepare_readout_params(w1, b1, w2, b2, N_NODES, h_dtype=h.dtype)
    out = readout_forward(h, params, graph_targets, classify=False)
    jax.block_until_ready(out)

    # Reference check in plain JAX (mirrors the PyTorch module)
    x_ref = jnp.mean(h, axis=0)
    z_ref = x_ref @ w1 + b1
    z_ref = jnp.where(z_ref > 0, z_ref, 0.01 * z_ref)
    y_ref = z_ref @ w2 + b2
    for i, (name, _d) in enumerate(graph_targets):
        assert jnp.allclose(out[name], y_ref[:, i], atol=1e-4, rtol=1e-4), name

    print("KERNEL_OK")
</pallas_src>

<mosaic_0001>
module attributes {stable_mosaic.version = 11 : i64} {
  func.func @_readout_kernel(%arg0: i32, %arg1: memref<8x256xf32, #tpu.memory_space<vmem>>, %arg2: memref<256x128xf32, #tpu.memory_space<vmem>>, %arg3: memref<1x128xf32, #tpu.memory_space<vmem>>, %arg4: memref<128x128xf32, #tpu.memory_space<vmem>>, %arg5: memref<1x128xf32, #tpu.memory_space<vmem>>, %arg6: memref<8x128xf32, #tpu.memory_space<vmem>>) attributes {dimension_semantics = [#tpu.dimension_semantics<parallel>], iteration_bounds = array<i64: 1>, scalar_prefetch = 0 : i64, scratch_operands = 0 : i64, tpu.core_type = #tpu.core_type<tc>, window_params = [{transform_indices = @transform_0, window_bounds = array<i64: 8, 256>}, {pipeline_mode = #tpu.pipeline_mode<synchronous>, transform_indices = @transform_1, window_bounds = array<i64: 256, 128>}, {pipeline_mode = #tpu.pipeline_mode<synchronous>, transform_indices = @transform_2, window_bounds = array<i64: 1, 128>}, {pipeline_mode = #tpu.pipeline_mode<synchronous>, transform_indices = @transform_3, window_bounds = array<i64: 128, 128>}, {pipeline_mode = #tpu.pipeline_mode<synchronous>, transform_indices = @transform_4, window_bounds = array<i64: 1, 128>}, {transform_indices = @transform_5, window_bounds = array<i64: 8, 128>}]} {
    %c0 = arith.constant 0 : index
    %c0_0 = arith.constant 0 : index
    %0 = vector.load %arg1[%c0, %c0_0] : memref<8x256xf32, #tpu.memory_space<vmem>>, vector<8x256xf32>
    %c0_1 = arith.constant 0 : index
    %c0_2 = arith.constant 0 : index
    %1 = vector.load %arg2[%c0_1, %c0_2] : memref<256x128xf32, #tpu.memory_space<vmem>>, vector<256x128xf32>
    %cst = arith.constant dense<0.000000e+00> : vector<8x128xf32>
    %2 = tpu.matmul %0, %1, %cst {dimension_numbers = #tpu.dot_dimension_numbers<[1], [0], [0], [1], [0, 0, 1, 1], [], []>} : vector<8x256xf32>, vector<256x128xf32>, vector<8x128xf32> -> vector<8x128xf32>
    %c0_3 = arith.constant 0 : index
    %c0_4 = arith.constant 0 : index
    %3 = vector.load %arg3[%c0_3, %c0_4] : memref<1x128xf32, #tpu.memory_space<vmem>>, vector<1x128xf32>
    %4 = vector.broadcast %3 : vector<1x128xf32> to vector<8x128xf32>
    %5 = arith.addf %2, %4 : vector<8x128xf32>
    %cst_5 = arith.constant 0.000000e+00 : f32
    %6 = vector.broadcast %cst_5 : f32 to vector<8x128xf32>
    %7 = arith.cmpf ogt, %5, %6 : vector<8x128xf32>
    %cst_6 = arith.constant 0.00999999977 : f32
    %8 = vector.broadcast %cst_6 : f32 to vector<8x128xf32>
    %9 = arith.mulf %8, %5 : vector<8x128xf32>
    %10 = arith.select %7, %5, %9 : vector<8x128xi1>, vector<8x128xf32>
    %c0_7 = arith.constant 0 : index
    %c0_8 = arith.constant 0 : index
    %11 = vector.load %arg4[%c0_7, %c0_8] : memref<128x128xf32, #tpu.memory_space<vmem>>, vector<128x128xf32>
    %cst_9 = arith.constant dense<0.000000e+00> : vector<8x128xf32>
    %12 = tpu.matmul %10, %11, %cst_9 {dimension_numbers = #tpu.dot_dimension_numbers<[1], [0], [0], [1], [0, 0, 1, 1], [], []>} : vector<8x128xf32>, vector<128x128xf32>, vector<8x128xf32> -> vector<8x128xf32>
    %c0_10 = arith.constant 0 : index
    %c0_11 = arith.constant 0 : index
    %13 = vector.load %arg5[%c0_10, %c0_11] : memref<1x128xf32, #tpu.memory_space<vmem>>, vector<1x128xf32>
    %14 = vector.broadcast %13 : vector<1x128xf32> to vector<8x128xf32>
    %15 = arith.addf %12, %14 : vector<8x128xf32>
    %c0_12 = arith.constant 0 : index
    %c0_13 = arith.constant 0 : index
    %16 = vector.load %arg6[%c0_12, %c0_13] : memref<8x128xf32, #tpu.memory_space<vmem>>, vector<8x128xf32>
    tpu.vector_store %arg6[%c0_12, %c0_13], %15 {strides = array<i32>} : memref<8x128xf32, #tpu.memory_space<vmem>>, vector<8x128xf32>,
    return
  }
  func.func @transform_0(%arg0: i32) -> (i32, i32) {
    %c0_i32 = arith.constant 0 : i32
    %c0_i32_0 = arith.constant 0 : i32
    return %arg0, %c0_i32 : i32, i32
  }
  func.func @transform_1(%arg0: i32) -> (i32, i32) {
    %c0_i32 = arith.constant 0 : i32
    %c0_i32_0 = arith.constant 0 : i32
    %c0_i32_1 = arith.constant 0 : i32
    return %c0_i32, %c0_i32_0 : i32, i32
  }
  func.func @transform_2(%arg0: i32) -> (i32, i32) {
    %c0_i32 = arith.constant 0 : i32
    %c0_i32_0 = arith.constant 0 : i32
    %c0_i32_1 = arith.constant 0 : i32
    return %c0_i32, %c0_i32_0 : i32, i32
  }
  func.func @transform_3(%arg0: i32) -> (i32, i32) {
    %c0_i32 = arith.constant 0 : i32
    %c0_i32_0 = arith.constant 0 : i32
    %c0_i32_1 = arith.constant 0 : i32
    return %c0_i32, %c0_i32_0 : i32, i32
  }
  func.func @transform_4(%arg0: i32) -> (i32, i32) {
    %c0_i32 = arith.constant 0 : i32
    %c0_i32_0 = arith.constant 0 : i32
    %c0_i32_1 = arith.constant 0 : i32
    return %c0_i32, %c0_i32_0 : i32, i32
  }
  func.func @transform_5(%arg0: i32) -> (i32, i32) {
    %c0_i32 = arith.constant 0 : i32
    %c0_i32_0 = arith.constant 0 : i32
    return %arg0, %c0_i32 : i32, i32
  }
}

</mosaic_0001>

<bundles_post_ra>
// kernel: tpu_custom_call.1
= control target key start
LH: loop header
LB: loop body
LE: loop exit
PB: predicated region body
PF: predicated region fallthrough
CT: control target
= control target key end

     0   :  { %10 = vsyncpa [#allocation3], 0  ;;  %s540_s0 = inlined_call_operand.hbm [shape: f32[8,256], index: 0, kind: input, shape index: {}]   ;;  %s541_s1 = inlined_call_operand.hbm [shape: f32[256,128], index: 1, kind: input, shape index: {}]   ;;  %s542_s2 = inlined_call_operand.vmem [shape: f32[1,128], index: 2, kind: input, shape index: {}]   ;;  %s543_s3 = inlined_call_operand.hbm [shape: f32[128,128], index: 3, kind: input, shape index: {}]   ;;  %s544_s4 = inlined_call_operand.vmem [shape: f32[1,128], index: 4, kind: input, shape index: {}]   ;;  %s545_s5 = inlined_call_operand.hbm [shape: f32[8,128], index: 5, kind: output, shape index: {}]  }
   0x1   :  { %11 = vsyncpa [#allocation6], 0 }
   0x2   :  { %12 = vsyncpa [#allocation4], 0  ;;  %s467_s18 = smov [#allocation5]  }
   0x3   :  { %s28_s19 = sshll.u32 %s467_s18, 4  ;;  %s29_s19 = int_to_ptr.vmem [resolvable:$true] %s28_s19 }
   0x4   :  { %s389_s20 = scalar_lea.vmem %s29_s19, 4096  ;;  %p394_p1 = scmp.lt.s32.totalorder %s29_s19, %s29_s19 }
   0x5   :  { %p390_p0 = scmp.ne.s32.totalorder %s29_s19, %s389_s20  ;;  %p395_p2 = scmp.lt.s32.totalorder %s389_s20, %s389_s20 }
   0x7   :  { %p396_p3 = por %p395_p2, %p394_p1 }
   0x9   :  { %p397_p4 = pnand %p396_p3, %p390_p0 }
   0xb   :  { %400 = shalt.err (!%p397_p4)
}
   0xc   :  { %s468_s21 = smov 128   ;;  %s469_s22 = smov 8  }
   0xd   :  { %34 = dma.hbm_to_vmem [thread:$0]  %s541_s1, 4096, %s29_s19, [#allocation6], %s468_s21, %s468_s21, %s469_s22  }
   0xe   :  { %s470_s25 = smov [#allocation2]   ;;  %s471_s27 = smov [#allocation7]  }
   0xf   :  { %s19_s26 = sshll.u32 %s470_s25, 4  ;;  %s42_s28 = sshll.u32 %s471_s27, 4  ;;  %s20_s26 = int_to_ptr.vmem [resolvable:$true] %s19_s26  ;;  %s43_s28 = int_to_ptr.vmem [resolvable:$true] %s42_s28 }
  0x10   :  { %s409_s29 = scalar_lea.vmem %s20_s26, 256  ;;  %p414_p6 = scmp.lt.s32.totalorder %s20_s26, %s20_s26 }
  0x11   :  { %p410_p5 = scmp.ne.s32.totalorder %s20_s26, %s409_s29  ;;  %p415_p7 = scmp.lt.s32.totalorder %s409_s29, %s409_s29 }
  0x13   :  { %p416_p8 = por %p415_p7, %p414_p6 }
  0x15   :  { %p417_p9 = pnand %p416_p8, %p410_p5 }
  0x17   :  { %420 = shalt.err (!%p417_p9)
}
  0x18   :  { %22 = dma.hbm_to_vmem [thread:$0]  %s540_s0, 256, %s20_s26, [#allocation3]  }
  0x19   :  { %s429_s7 = scalar_lea.vmem %s43_s28, 2048  ;;  %p434_p11 = scmp.lt.s32.totalorder %s43_s28, %s43_s28 }
  0x1a   :  { %p430_p10 = scmp.ne.s32.totalorder %s43_s28, %s429_s7  ;;  %p435_p12 = scmp.lt.s32.totalorder %s429_s7, %s429_s7 }
  0x1c   :  { %p436_p13 = por %p435_p12, %p434_p11 }
  0x1e   :  { %p437_p0 = pnand %p436_p13, %p430_p10 }
  0x20   :  { %440 = shalt.err (!%p437_p0)
}
  0x21   :  { %48 = dma.hbm_to_vmem [thread:$0]  %s543_s3, 2048, %s43_s28, [#allocation6], %s468_s21, %s468_s21, %s469_s22  }
  0x22   :  { %461 = dma.done.wait [#allocation3], 256  }
  0x23   :  { %462 = vsyncadd [#allocation3], 4294967040 }
  0x24   :  { %463 = dma.done.wait [#allocation6], 6144  }
  0x25   :  { %464 = vsyncadd [#allocation6], 4294961152  ;;  %v472_v0 = vmov 0.0   ;;  %v93_v1 = vld [vmem:[#allocation5 + $0xf8] sm:$0xff]  ;;  %v92_v3 = vld [vmem:[#allocation5 + $0xf0] sm:$0xff]  ;;  %vm473_vm0 = vmmov 0  }
  0x26   :  { %338 = vmatprep.subr.mxu1 %v472_v0  ;;  %v77_v2 = vld [vmem:[#allocation5 + $0x78] sm:$0xff]  ;;  %286 = vmatprep.subr.mxu0 %v93_v1  ;;  %v76_v4 = vld [vmem:[#allocation5 + $0x70] sm:$0xff]  ;;  %v91_v5 = vld [vmem:[#allocation5 + $0xe8] sm:$0xff]  ;;  %s474_s11 = smov [#allocation8]  }
  0x27   :  { %287 = vmatpush3.msra.mxu0 %v77_v2  ;;  %v75_v6 = vld [vmem:[#allocation5 + $0x68] sm:$0xff]  ;;  %v90_v7 = vld [vmem:[#allocation5 + $0xe0] sm:$0xff]  ;;  %v89_v9 = vld [vmem:[#allocation5 + $0xd8] sm:$0xff]  ;;  %370 = vmatprep.mubr.msk.f32.mxu1 %vm473_vm0, %v472_v0  ;;  %s274_s12 = sshll.u32 %s474_s11, 4  ;;  %s275_s12 = int_to_ptr.vmem [resolvable:$true] %s274_s12 }
  0x28   :  { %288 = vmatprep.subr.mxu0 %v92_v3  ;;  %v74_v8 = vld [vmem:[#allocation5 + $0x60] sm:$0xff]  ;;  %v73_v10 = vld [vmem:[#allocation5 + $0x58] sm:$0xff]  ;;  %v88_v11 = vld [vmem:[#allocation5 + $0xd0] sm:$0xff]  ;;  %s441_s13 = scalar_lea.vmem %s275_s12, 128  ;;  %p446_p2 = scmp.lt.s32.totalorder %s275_s12, %s275_s12 }
  0x29   :  { %289 = vmatpush3.msra.mxu0 %v76_v4  ;;  %v72_v12 = vld [vmem:[#allocation5 + $0x50] sm:$0xff]  ;;  %v87_v13 = vld [vmem:[#allocation5 + $0xc8] sm:$0xff]  ;;  %v61_v14 = vld [vmem:[#allocation2 + $0x8] sm:$0xff]  ;;  %p442_p1 = scmp.ne.s32.totalorder %s275_s12, %s441_s13  ;;  %p447_p3 = scmp.lt.s32.totalorder %s441_s13, %s441_s13 }
  0x2a   :  { %290 = vmatprep.subr.mxu0 %v91_v5  ;;  %v71_v15 = vld [vmem:[#allocation5 + $0x48] sm:$0xff]  ;;  %165 = vmatprep.mubr.f32.mxu0 %v61_v14  ;;  %v189_v16 = vld [vmem:[#allocation7 + $0x78] sm:$0xff]  ;;  %v188_v17 = vld [vmem:[#allocation7 + $0x70] sm:$0xff] }
  0x2b   :  { %291 = vmatpush3.msra.mxu0 %v75_v6  ;;  %v86_v18 = vld [vmem:[#allocation5 + $0xc0] sm:$0xff]  ;;  %339 = vmatpush3.msra.mxu1 %v189_v16  ;;  %v187_v20 = vld [vmem:[#allocation7 + $0x68] sm:$0xff]  ;;  %v85_v21 = vld [vmem:[#allocation5 + $0xb8] sm:$0xff]  ;;  %p448_p4 = por %p447_p3, %p446_p2 }
  0x2c   :  { %292 = vmatprep.subr.mxu0 %v90_v7  ;;  %v70_v19 = vld [vmem:[#allocation5 + $0x40] sm:$0xff]  ;;  %340 = vmatprep.subr.mxu1 %v472_v0  ;;  %v69_v22 = vld [vmem:[#allocation5 + $0x38] sm:$0xff]  ;;  %v84_v24 = vld [vmem:[#allocation5 + $0xb0] sm:$0xff] }
  0x2d   :  { %293 = vmatpush3.msra.mxu0 %v74_v8  ;;  %341 = vmatpush3.msra.mxu1 %v188_v17  ;;  %v186_v23 = vld [vmem:[#allocation7 + $0x60] sm:$0xff]  ;;  %v68_v25 = vld [vmem:[#allocation5 + $0x30] sm:$0xff]  ;;  %v185_v26 = vld [vmem:[#allocation7 + $0x58] sm:$0xff]  ;;  %p449_p5 = pnand %p448_p4, %p442_p1 }
  0x2e   :  { %294 = vmatprep.subr.mxu0 %v89_v9  ;;  %342 = vmatprep.subr.mxu1 %v472_v0  ;;  %v83_v27 = vld [vmem:[#allocation5 + $0xa8] sm:$0xff]  ;;  %v184_v29 = vld [vmem:[#allocation7 + $0x50] sm:$0xff]  ;;  %v82_v30 = vld [vmem:[#allocation5 + $0xa0] sm:$0xff] }
  0x2f   :  { %295 = vmatpush3.msra.mxu0 %v73_v10  ;;  %343 = vmatpush3.msra.mxu1 %v187_v20  ;;  %v67_v28 = vld [vmem:[#allocation5 + $0x28] sm:$0xff]  ;;  %v66_v31 = vld [vmem:[#allocation5 + $0x20] sm:$0xff]  ;;  %v81_v33 = vld [vmem:[#allocation5 + $0x98] sm:$0xff] }
  0x30   :  { %296 = vmatprep.subr.mxu0 %v88_v11  ;;  %344 = vmatprep.subr.mxu1 %v472_v0  ;;  %v183_v32 = vld [vmem:[#allocation7 + $0x48] sm:$0xff]  ;;  %v65_v34 = vld [vmem:[#allocation5 + $0x18] sm:$0xff]  ;;  %v182_v35 = vld [vmem:[#allocation7 + $0x40] sm:$0xff] }
  0x31   :  { %297 = vmatpush3.msra.mxu0 %v72_v12  ;;  %345 = vmatpush3.msra.mxu1 %v186_v23  ;;  %v80_v36 = vld [vmem:[#allocation5 + $0x90] sm:$0xff]  ;;  %v181_v38 = vld [vmem:[#allocation7 + $0x38] sm:$0xff]  ;;  %v79_v39 = vld [vmem:[#allocation5 + $0x88] sm:$0xff] }
  0x32   :  { %298 = vmatprep.subr.mxu0 %v87_v13  ;;  %346 = vmatprep.subr.mxu1 %v472_v0  ;;  %v64_v37 = vld [vmem:[#allocation5 + $0x10] sm:$0xff]  ;;  %v63_v40 = vld [vmem:[#allocation5 + $0x8] sm:$0xff]  ;;  %v78_v42 = vld [vmem:[#allocation5 + $0x80] sm:$0xff] }
  0x33   :  { %299 = vmatpush3.msra.mxu0 %v71_v15  ;;  %347 = vmatpush3.msra.mxu1 %v185_v26  ;;  %v180_v41 = vld [vmem:[#allocation7 + $0x30] sm:$0xff]  ;;  %v62_v43 = vld [vmem:[#allocation5] sm:$0xff]  ;;  %v179_v44 = vld [vmem:[#allocation7 + $0x28] sm:$0xff] }
  0x34   :  { %300 = vmatprep.subr.mxu0 %v86_v18  ;;  %348 = vmatprep.subr.mxu1 %v472_v0  ;;  %v60_v45 = vld [vmem:[#allocation2] sm:$0xff]  ;;  %v178_v46 = vld [vmem:[#allocation7 + $0x20] sm:$0xff]  ;;  %v177_v47 = vld [vmem:[#allocation7 + $0x18] sm:$0xff] }
  0x35   :  { %301 = vmatpush3.msra.mxu0 %v70_v19  ;;  %349 = vmatpush3.msra.mxu1 %v184_v29  ;;  %v176_v48 = vld [vmem:[#allocation7 + $0x10] sm:$0xff]  ;;  %v175_v49 = vld [vmem:[#allocation7 + $0x8] sm:$0xff]  ;;  %v174_v50 = vld [vmem:[#allocation7] sm:$0xff] }
  0x36   :  { %302 = vmatprep.subr.mxu0 %v85_v21  ;;  %350 = vmatprep.subr.mxu1 %v472_v0  ;;  %v284_v52 = vld [vmem:[%s542_s2] ss:$0 sm:$0xff] }
  0x37   :  { %303 = vmatpush3.msra.mxu0 %v69_v22  ;;  %351 = vmatpush3.msra.mxu1 %v183_v32  ;;  %v285_v58 = vld [vmem:[%s544_s4] ss:$0 sm:$0xff] }
  0x38   :  { %304 = vmatprep.subr.mxu0 %v84_v24  ;;  %352 = vmatprep.subr.mxu1 %v472_v0 }
  0x39   :  { %305 = vmatpush3.msra.mxu0 %v68_v25  ;;  %353 = vmatpush3.msra.mxu1 %v182_v35 }
  0x3a   :  { %306 = vmatprep.subr.mxu0 %v83_v27  ;;  %354 = vmatprep.subr.mxu1 %v472_v0 }
  0x3b   :  { %307 = vmatpush3.msra.mxu0 %v67_v28  ;;  %355 = vmatpush3.msra.mxu1 %v181_v38 }
  0x3c   :  { %308 = vmatprep.subr.mxu0 %v82_v30  ;;  %356 = vmatprep.subr.mxu1 %v472_v0 }
  0x3d   :  { %309 = vmatpush3.msra.mxu0 %v66_v31  ;;  %357 = vmatpush3.msra.mxu1 %v180_v41 }
  0x3e   :  { %310 = vmatprep.subr.mxu0 %v81_v33  ;;  %358 = vmatprep.subr.mxu1 %v472_v0 }
  0x3f   :  { %311 = vmatpush3.msra.mxu0 %v65_v34  ;;  %359 = vmatpush3.msra.mxu1 %v179_v44 }
  0x40   :  { %312 = vmatprep.subr.mxu0 %v80_v36  ;;  %360 = vmatprep.subr.mxu1 %v472_v0 }
  0x41   :  { %313 = vmatpush3.msra.mxu0 %v64_v37  ;;  %361 = vmatpush3.msra.mxu1 %v178_v46 }
  0x42   :  { %314 = vmatprep.subr.mxu0 %v79_v39  ;;  %362 = vmatprep.subr.mxu1 %v472_v0 }
  0x43   :  { %315 = vmatpush3.msra.mxu0 %v63_v40  ;;  %363 = vmatpush3.msra.mxu1 %v177_v47 }
  0x44   :  { %316 = vmatprep.subr.mxu0 %v78_v42  ;;  %364 = vmatprep.subr.mxu1 %v472_v0 }
  0x45   :  { %317 = vmatpush3.msra.mxu0 %v62_v43  ;;  %365 = vmatpush3.msra.mxu1 %v176_v48 }
  0x46   :  { %166 = vmatmul.mubr.f32.vlgmr.msra.gmra.mxu0 %v60_v45  ;;  %366 = vmatprep.subr.mxu1 %v472_v0 }
  0x47   :  { %367 = vmatpush3.msra.mxu1 %v175_v49 }
  0x48   :  { %368 = vmatprep.subr.mxu1 %v472_v0 }
  0x49   :  { %369 = vmatpush3.msra.mxu1 %v174_v50 }
 0x106   :  { %v318_v51 = vpop.f32.mrf.mxu0 }
 0x108   :  { %v319_v53 = vpop.f32.mrf.mxu0 }
 0x109   :  { %v320_v54 = vadd.f32 %v319_v53, %v318_v51 }
 0x10b   :  { %v168_v55 = vadd.f32 %v320_v54, %v284_v52 }
 0x10d   :  { %vm171_vm1 = vcmp.gt.f32.partialorder %v168_v55, 0.0  ;;  %v172_v56 = vmul.f32 0.01, %v168_v55 }
 0x10f   :  { %v173_v57 = vsel %vm171_vm1, %v168_v55, %v172_v56 }
 0x110   :  { %371 = vmatmul.mubr.f32.vlgmr.msra.gmra.mxu1 %v173_v57 }
 0x1d0   :  { %v263_v59 = vpop.f32.mrf.mxu1 }
 0x1d1   :  { %v264_v60 = vadd.f32 %v285_v58, %v263_v59 }
 0x1d2   :  { %v372_v61 = vpop.f32.mrf.mxu1 }
 0x1d3   :  { %267 = vst [vmem:[#allocation8] sm:$0xff] %v264_v60 }
 0x1d4   :  { %452 = shalt.err (!%p449_p5)
}
 0x1d5   :  { %277 = dma.vmem_to_hbm [thread:$0]  %s275_s12, 128, %s545_s5, [#allocation4]  }
 0x1d6   :  { %465 = dma.done.wait [#allocation4], 128  }
 0x1d7   :  { %466 = vsyncadd [#allocation4], 4294967168 }
 0x1d8   :  { %281 = vsyncpa [#allocation3], 1 }
 0x1d9   :  { %282 = vsyncpa [#allocation6], 1 }
 0x1da   :  { %283 = vsyncpa [#allocation4], 1 }

</bundles_post_ra>
